<compile_context>
chip_gen: v7x
topology: tpu7x:2x2x1
jax: 0.10.0
libtpu: 0.0.40
codegen_flags: <defaults>
</compile_context>

<pallas_src>
import functools

import jax
import jax.numpy as jnp
from jax.experimental import pallas as pl
from jax.experimental.pallas import tpu as pltpu


LN_EPS = 1e-5
LANE = 128      # lane width (last dim)
SUBLANE = 8     # f32 sublane width (second-to-last dim)


def _round_up(x, m):
    return (x + m - 1) // m * m


def _vmem_capacity_bytes():
    """Per-TensorCore VMEM capacity; conservative fallback if the query is unavailable."""
    try:
        return int(pltpu.get_tpu_info().vmem_capacity_bytes)
    except Exception:
        return 64 * 1024 * 1024   # v7x per-TC budget; safe lower bound


def _make_mlp_kernel(num_layers, true_input_dim):
    """Fused kernel: LayerNorm (true feature width) + bf16xbf16->f32 matmul stack."""

    def kernel(*refs):
        # refs: x, ln_gamma, ln_beta, (w_l, b_l) * num_layers, out
        x_ref, g_ref, beta_ref = refs[0], refs[1], refs[2]
        o_ref = refs[-1]
        wb_refs = refs[3:3 + 2 * num_layers]

        # --- LayerNorm over the true feature width (no padded lanes in view) --
        x = x_ref[...].astype(jnp.float32)                      # (TM, input_dim)
        inv_d = jnp.float32(1.0 / true_input_dim)
        mu = jnp.sum(x, axis=-1, keepdims=True) * inv_d
        ex2 = jnp.sum(x * x, axis=-1, keepdims=True) * inv_d
        var = ex2 - mu * mu                                     # covered by LN_EPS
        h = (x - mu) * jax.lax.rsqrt(var + LN_EPS)
        h = h * g_ref[...].astype(jnp.float32) + beta_ref[...].astype(jnp.float32)

        # --- Linear stack: bf16 operands/intermediates, f32 MXU accumulation ---
        hb = h.astype(jnp.bfloat16)
        acc = None
        for l in range(num_layers):
            w = wb_refs[2 * l][...]                              # bf16 (K_l, outpad_l)
            b = wb_refs[2 * l + 1][...].astype(jnp.float32)      # (1, outpad_l)
            acc = jnp.dot(hb, w, preferred_element_type=jnp.float32) + b
            if l != num_layers - 1:
                hb = jnp.maximum(acc, 0.0).astype(jnp.bfloat16)  # ReLU; dropout = identity

        o_ref[...] = acc.astype(o_ref.dtype)

    return kernel


def prepare_params(ln_gamma, ln_beta, weights, biases):
    """One-time parameter prep (call at init, NOT per forward).

    * weights[l] (in_l, out_l) f32 -> bf16, output dim zero-padded to 128 lanes.
      Layer 0 keeps its true input dim as K (matches the unpadded activations);
      layers >= 1 zero-pad K to the previous layer's padded output width.
    * biases -> f32 (1, out_pad), zero-padded.
    * gamma/beta -> f32 (1, input_dim), unpadded.
    """
    dims = [weights[0].shape[0]] + [w.shape[1] for w in weights]
    dims_pad = [dims[0]] + [_round_up(d, LANE) for d in dims[1:]]

    ws_p, bs_p = [], []
    for l, (w, b) in enumerate(zip(weights, biases)):
        k_dim = dims[0] if l == 0 else dims_pad[l]
        n_pad = dims_pad[l + 1]
        wp = jnp.zeros((k_dim, n_pad), jnp.bfloat16)
        wp = wp.at[:w.shape[0], :w.shape[1]].set(w.astype(jnp.bfloat16))
        bp = jnp.zeros((1, n_pad), jnp.float32)
        bp = bp.at[:, :w.shape[1]].set(b.reshape(1, -1))
        ws_p.append(wp)
        bs_p.append(bp)

    g = jnp.asarray(ln_gamma, jnp.float32).reshape(1, -1)
    bt = jnp.asarray(ln_beta, jnp.float32).reshape(1, -1)
    return g, bt, tuple(ws_p), tuple(bs_p)


@functools.partial(jax.jit, static_argnames=("out_dim",))
def mlp_forward(feats, ln_gamma_p, ln_beta_p, weights_p, biases_p, *, out_dim):
    """feats: (N, input_dim) f32.  weights_p/biases_p from prepare_params."""
    N, input_dim = feats.shape
    num_layers = len(weights_p)
    dims_pad = [input_dim] + [int(w.shape[1]) for w in weights_p]
    out_pad = dims_pad[-1]

    # ---- chip-aware tiling -----------------------------------------------------
    vmem_cap = _vmem_capacity_bytes()
    tm_max = 1024 if vmem_cap >= (100 << 20) else 512    # v5e/v6e: 128 MiB, v7x: 64 MiB

    # Balanced batch tiles (padding waste bounded by <8 rows/tile); force >=2 grid
    # steps for N>=16 so dimension_semantics=("parallel",) can use both v7x cores.
    min_tiles = 2 if N >= 16 else 1
    num_tiles = max(pl.cdiv(N, tm_max), min_tiles)
    TM = _round_up(pl.cdiv(N, num_tiles), SUBLANE)
    grid = (pl.cdiv(N, TM),)

    # ---- BlockSpecs: activation tiles walk the batch grid; params fetched once ---
    param_mode = pl.Buffered(1)     # grid-invariant -> single VMEM buffer, no 2x residency
    in_specs = [
        pl.BlockSpec((TM, input_dim), lambda i: (i, 0)),
        pl.BlockSpec((1, input_dim), lambda i: (0, 0), pipeline_mode=param_mode),
        pl.BlockSpec((1, input_dim), lambda i: (0, 0), pipeline_mode=param_mode),
    ]
    for w, b in zip(weights_p, biases_p):
        in_specs.append(pl.BlockSpec(tuple(int(d) for d in w.shape),
                                     lambda i: (0, 0), pipeline_mode=param_mode))
        in_specs.append(pl.BlockSpec(tuple(int(d) for d in b.shape),
                                     lambda i: (0, 0), pipeline_mode=param_mode))
    out_spec = pl.BlockSpec((TM, out_pad), lambda i: (i, 0))

    # ---- cost estimate + VMEM budget --------------------------------------------
    weight_bytes = sum(int(w.size) * w.dtype.itemsize for w in weights_p)
    bias_bytes = sum(int(b.size) * 4 for b in biases_p)
    param_bytes = weight_bytes + bias_bytes + 2 * input_dim * 4
    flops = 2 * N * sum(int(w.shape[0]) * int(w.shape[1]) for w in weights_p)
    bytes_accessed = N * input_dim * 4 + param_bytes + N * out_pad * 4
    cost = pl.CostEstimate(flops=flops, transcendentals=N,
                           bytes_accessed=bytes_accessed)

    max_pad = max(dims_pad)
    vmem_needed = (2 * TM * input_dim * 4       # double-buffered activation tiles
                   + 2 * TM * out_pad * 4       # double-buffered output tiles
                   + param_bytes                # single-buffered resident params
                   + 4 * TM * max_pad * 4)      # slack for in-kernel intermediates
    vmem_limit = int(min(max(vmem_needed, 16 << 20), int(0.9 * vmem_cap)))

    operands = [feats, ln_gamma_p, ln_beta_p]
    for w, b in zip(weights_p, biases_p):
        operands += [w, b]

    out_padded = pl.pallas_call(
        _make_mlp_kernel(num_layers, input_dim),
        out_shape=jax.ShapeDtypeStruct((N, out_pad), jnp.float32),
        grid=grid,
        in_specs=in_specs,
        out_specs=out_spec,
        compiler_params=pltpu.CompilerParams(
            dimension_semantics=("parallel",),
            vmem_limit_bytes=vmem_limit),
        cost_estimate=cost,
    )(*operands)

    return out_padded[:, :out_dim]


def _init_params(key, num_layers, input_dim, hidden_dim, output_dim):
    """Deterministic init mirroring nn.Linear / nn.LayerNorm shapes."""
    ln_gamma = jnp.ones((1, input_dim), jnp.float32)
    ln_beta = jnp.zeros((1, input_dim), jnp.float32)

    dims = ([input_dim, output_dim] if num_layers == 1
            else [input_dim] + [hidden_dim] * (num_layers - 1) + [output_dim])

    weights, biases = [], []
    for l in range(num_layers):
        fan_in, fan_out = dims[l], dims[l + 1]
        key, kw, kb = jax.random.split(key, 3)
        bound = 1.0 / float(jnp.sqrt(jnp.float32(fan_in)))
        # stored as (in, out) == torch Linear weight.T
        w = jax.random.uniform(kw, (fan_in, fan_out), jnp.float32, -bound, bound)
        b = jax.random.uniform(kb, (1, fan_out), jnp.float32, -bound, bound)
        weights.append(w)
        biases.append(b)
    return ln_gamma, ln_beta, weights, biases


def _reference(feats, ln_gamma, ln_beta, weights, biases, bf16_operands):
    num_layers = len(weights)
    x = feats.astype(jnp.float32)
    d = x.shape[-1]
    mu = jnp.sum(x, -1, keepdims=True) / d
    if bf16_operands:
        # mirror the kernel's variance formula for a tight comparison
        var = jnp.sum(x * x, -1, keepdims=True) / d - mu * mu
    else:
        var = jnp.mean((x - mu) ** 2, -1, keepdims=True)
    h = (x - mu) * jax.lax.rsqrt(var + LN_EPS) * ln_gamma.reshape(1, -1) \
        + ln_beta.reshape(1, -1)
    for l in range(num_layers):
        if bf16_operands:
            h = jnp.dot(h.astype(jnp.bfloat16), weights[l].astype(jnp.bfloat16),
                        preferred_element_type=jnp.float32) + biases[l].reshape(1, -1)
        else:
            h = h @ weights[l] + biases[l].reshape(1, -1)
        if l != num_layers - 1:
            h = jnp.maximum(h, 0.0)
    return h


if __name__ == "__main__":
    num_layers = 3
    batch, input_dim, hidden_dim, output_dim = 8, 32, 64, 16

    key = jax.random.PRNGKey(0)
    key, kx = jax.random.split(key)
    feats = jax.random.normal(kx, (batch, input_dim), jnp.float32)

    ln_gamma, ln_beta, weights, biases = _init_params(
        key, num_layers, input_dim, hidden_dim, output_dim)

    # One-time parameter padding / bf16 cast (hoisted out of the per-call path).
    g_p, bt_p, ws_p, bs_p = prepare_params(ln_gamma, ln_beta, weights, biases)

    out = mlp_forward(feats, g_p, bt_p, ws_p, bs_p, out_dim=output_dim)
    out = jax.block_until_ready(out)
    assert out.shape == (batch, output_dim)

    # Check against a reference using the same bf16 matmul operands, plus a looser
    # check against the pure-f32 PyTorch-equivalent math.
    ref_bf16 = _reference(feats, ln_gamma, ln_beta, weights, biases, bf16_operands=True)
    ref_f32 = _reference(feats, ln_gamma, ln_beta, weights, biases, bf16_operands=False)
    assert jnp.allclose(out, ref_bf16, atol=1e-2, rtol=1e-2), \
        float(jnp.max(jnp.abs(out - ref_bf16)))
    assert jnp.allclose(out, ref_f32, atol=5e-2, rtol=5e-2), \
        float(jnp.max(jnp.abs(out - ref_f32)))

    print("KERNEL_OK")
</pallas_src>

<mosaic_0001>
module attributes {stable_mosaic.version = 11 : i64} {
  func.func @kernel(%arg0: i32, %arg1: memref<8x32xf32, #tpu.memory_space<vmem>>, %arg2: memref<1x32xf32, #tpu.memory_space<vmem>>, %arg3: memref<1x32xf32, #tpu.memory_space<vmem>>, %arg4: memref<32x128xbf16, #tpu.memory_space<vmem>>, %arg5: memref<1x128xf32, #tpu.memory_space<vmem>>, %arg6: memref<128x128xbf16, #tpu.memory_space<vmem>>, %arg7: memref<1x128xf32, #tpu.memory_space<vmem>>, %arg8: memref<128x128xbf16, #tpu.memory_space<vmem>>, %arg9: memref<1x128xf32, #tpu.memory_space<vmem>>, %arg10: memref<8x128xf32, #tpu.memory_space<vmem>>) attributes {dimension_semantics = [#tpu.dimension_semantics<parallel>], iteration_bounds = array<i64: 1>, scalar_prefetch = 0 : i64, scratch_operands = 0 : i64, tpu.core_type = #tpu.core_type<tc>, window_params = [{transform_indices = @transform_0, window_bounds = array<i64: 8, 32>}, {pipeline_mode = #tpu.pipeline_mode<synchronous>, transform_indices = @transform_1, window_bounds = array<i64: 1, 32>}, {pipeline_mode = #tpu.pipeline_mode<synchronous>, transform_indices = @transform_2, window_bounds = array<i64: 1, 32>}, {pipeline_mode = #tpu.pipeline_mode<synchronous>, transform_indices = @transform_3, window_bounds = array<i64: 32, 128>}, {pipeline_mode = #tpu.pipeline_mode<synchronous>, transform_indices = @transform_4, window_bounds = array<i64: 1, 128>}, {pipeline_mode = #tpu.pipeline_mode<synchronous>, transform_indices = @transform_5, window_bounds = array<i64: 128, 128>}, {pipeline_mode = #tpu.pipeline_mode<synchronous>, transform_indices = @transform_6, window_bounds = array<i64: 1, 128>}, {pipeline_mode = #tpu.pipeline_mode<synchronous>, transform_indices = @transform_7, window_bounds = array<i64: 128, 128>}, {pipeline_mode = #tpu.pipeline_mode<synchronous>, transform_indices = @transform_8, window_bounds = array<i64: 1, 128>}, {transform_indices = @transform_9, window_bounds = array<i64: 8, 128>}]} {
    %c0 = arith.constant 0 : index
    %c0_0 = arith.constant 0 : index
    %0 = vector.load %arg1[%c0, %c0_0] : memref<8x32xf32, #tpu.memory_space<vmem>>, vector<8x32xf32>
    %cst = arith.constant dense<0.000000e+00> : vector<8xf32>
    %1 = vector.multi_reduction <add>, %0, %cst [1] : vector<8x32xf32> to vector<8xf32>
    %2 = vector.shape_cast %1 : vector<8xf32> to vector<8x1xf32>
    %cst_1 = arith.constant 3.125000e-02 : f32
    %3 = vector.broadcast %cst_1 : f32 to vector<8x1xf32>
    %4 = arith.mulf %2, %3 : vector<8x1xf32>
    %5 = arith.mulf %0, %0 : vector<8x32xf32>
    %cst_2 = arith.constant dense<0.000000e+00> : vector<8xf32>
    %6 = vector.multi_reduction <add>, %5, %cst_2 [1] : vector<8x32xf32> to vector<8xf32>
    %7 = vector.shape_cast %6 : vector<8xf32> to vector<8x1xf32>
    %cst_3 = arith.constant 3.125000e-02 : f32
    %8 = vector.broadcast %cst_3 : f32 to vector<8x1xf32>
    %9 = arith.mulf %7, %8 : vector<8x1xf32>
    %10 = arith.mulf %4, %4 : vector<8x1xf32>
    %11 = arith.subf %9, %10 : vector<8x1xf32>
    %12 = vector.broadcast %4 : vector<8x1xf32> to vector<8x32xf32>
    %13 = arith.subf %0, %12 : vector<8x32xf32>
    %cst_4 = arith.constant 9.99999974E-6 : f32
    %14 = vector.broadcast %cst_4 : f32 to vector<8x1xf32>
    %15 = arith.addf %11, %14 : vector<8x1xf32>
    %16 = math.rsqrt %15 : vector<8x1xf32>
    %17 = vector.broadcast %16 : vector<8x1xf32> to vector<8x32xf32>
    %18 = arith.mulf %13, %17 : vector<8x32xf32>
    %c0_5 = arith.constant 0 : index
    %c0_6 = arith.constant 0 : index
    %19 = vector.load %arg2[%c0_5, %c0_6] : memref<1x32xf32, #tpu.memory_space<vmem>>, vector<1x32xf32>
    %20 = vector.broadcast %19 : vector<1x32xf32> to vector<8x32xf32>
    %21 = arith.mulf %18, %20 : vector<8x32xf32>
    %c0_7 = arith.constant 0 : index
    %c0_8 = arith.constant 0 : index
    %22 = vector.load %arg3[%c0_7, %c0_8] : memref<1x32xf32, #tpu.memory_space<vmem>>, vector<1x32xf32>
    %23 = vector.broadcast %22 : vector<1x32xf32> to vector<8x32xf32>
    %24 = arith.addf %21, %23 : vector<8x32xf32>
    %25 = arith.truncf %24 : vector<8x32xf32> to vector<8x32xbf16>
    %c0_9 = arith.constant 0 : index
    %c0_10 = arith.constant 0 : index
    %26 = vector.load %arg4[%c0_9, %c0_10] : memref<32x128xbf16, #tpu.memory_space<vmem>>, vector<32x128xbf16>
    %c0_11 = arith.constant 0 : index
    %c0_12 = arith.constant 0 : index
    %27 = vector.load %arg5[%c0_11, %c0_12] : memref<1x128xf32, #tpu.memory_space<vmem>>, vector<1x128xf32>
    %cst_13 = arith.constant dense<0.000000e+00> : vector<8x128xf32>
    %28 = tpu.matmul %25, %26, %cst_13 {dimension_numbers = #tpu.dot_dimension_numbers<[1], [0], [0], [1], [0, 0, 1, 1], [], []>} : vector<8x32xbf16>, vector<32x128xbf16>, vector<8x128xf32> -> vector<8x128xf32>
    %29 = vector.broadcast %27 : vector<1x128xf32> to vector<8x128xf32>
    %30 = arith.addf %28, %29 : vector<8x128xf32>
    %cst_14 = arith.constant 0.000000e+00 : f32
    %31 = vector.broadcast %cst_14 : f32 to vector<8x128xf32>
    %32 = arith.maximumf %30, %31 : vector<8x128xf32>
    %33 = arith.truncf %32 : vector<8x128xf32> to vector<8x128xbf16>
    %c0_15 = arith.constant 0 : index
    %c0_16 = arith.constant 0 : index
    %34 = vector.load %arg6[%c0_15, %c0_16] : memref<128x128xbf16, #tpu.memory_space<vmem>>, vector<128x128xbf16>
    %c0_17 = arith.constant 0 : index
    %c0_18 = arith.constant 0 : index
    %35 = vector.load %arg7[%c0_17, %c0_18] : memref<1x128xf32, #tpu.memory_space<vmem>>, vector<1x128xf32>
    %cst_19 = arith.constant dense<0.000000e+00> : vector<8x128xf32>
    %36 = tpu.matmul %33, %34, %cst_19 {dimension_numbers = #tpu.dot_dimension_numbers<[1], [0], [0], [1], [0, 0, 1, 1], [], []>} : vector<8x128xbf16>, vector<128x128xbf16>, vector<8x128xf32> -> vector<8x128xf32>
    %37 = vector.broadcast %35 : vector<1x128xf32> to vector<8x128xf32>
    %38 = arith.addf %36, %37 : vector<8x128xf32>
    %cst_20 = arith.constant 0.000000e+00 : f32
    %39 = vector.broadcast %cst_20 : f32 to vector<8x128xf32>
    %40 = arith.maximumf %38, %39 : vector<8x128xf32>
    %41 = arith.truncf %40 : vector<8x128xf32> to vector<8x128xbf16>
    %c0_21 = arith.constant 0 : index
    %c0_22 = arith.constant 0 : index
    %42 = vector.load %arg8[%c0_21, %c0_22] : memref<128x128xbf16, #tpu.memory_space<vmem>>, vector<128x128xbf16>
    %c0_23 = arith.constant 0 : index
    %c0_24 = arith.constant 0 : index
    %43 = vector.load %arg9[%c0_23, %c0_24] : memref<1x128xf32, #tpu.memory_space<vmem>>, vector<1x128xf32>
    %cst_25 = arith.constant dense<0.000000e+00> : vector<8x128xf32>
    %44 = tpu.matmul %41, %42, %cst_25 {dimension_numbers = #tpu.dot_dimension_numbers<[1], [0], [0], [1], [0, 0, 1, 1], [], []>} : vector<8x128xbf16>, vector<128x128xbf16>, vector<8x128xf32> -> vector<8x128xf32>
    %45 = vector.broadcast %43 : vector<1x128xf32> to vector<8x128xf32>
    %46 = arith.addf %44, %45 : vector<8x128xf32>
    %c0_26 = arith.constant 0 : index
    %c0_27 = arith.constant 0 : index
    %47 = vector.load %arg10[%c0_26, %c0_27] : memref<8x128xf32, #tpu.memory_space<vmem>>, vector<8x128xf32>
    tpu.vector_store %arg10[%c0_26, %c0_27], %46 {strides = array<i32>} : memref<8x128xf32, #tpu.memory_space<vmem>>, vector<8x128xf32>,
    return
  }
  func.func @transform_0(%arg0: i32) -> (i32, i32) {
    %c0_i32 = arith.constant 0 : i32
    %c0_i32_0 = arith.constant 0 : i32
    return %arg0, %c0_i32 : i32, i32
  }
  func.func @transform_1(%arg0: i32) -> (i32, i32) {
    %c0_i32 = arith.constant 0 : i32
    %c0_i32_0 = arith.constant 0 : i32
    %c0_i32_1 = arith.constant 0 : i32
    return %c0_i32, %c0_i32_0 : i32, i32
  }
  func.func @transform_2(%arg0: i32) -> (i32, i32) {
    %c0_i32 = arith.constant 0 : i32
    %c0_i32_0 = arith.constant 0 : i32
    %c0_i32_1 = arith.constant 0 : i32
    return %c0_i32, %c0_i32_0 : i32, i32
  }
  func.func @transform_3(%arg0: i32) -> (i32, i32) {
    %c0_i32 = arith.constant 0 : i32
    %c0_i32_0 = arith.constant 0 : i32
    %c0_i32_1 = arith.constant 0 : i32
    return %c0_i32, %c0_i32_0 : i32, i32
  }
  func.func @transform_4(%arg0: i32) -> (i32, i32) {
    %c0_i32 = arith.constant 0 : i32
    %c0_i32_0 = arith.constant 0 : i32
    %c0_i32_1 = arith.constant 0 : i32
    return %c0_i32, %c0_i32_0 : i32, i32
  }
  func.func @transform_5(%arg0: i32) -> (i32, i32) {
    %c0_i32 = arith.constant 0 : i32
    %c0_i32_0 = arith.constant 0 : i32
    %c0_i32_1 = arith.constant 0 : i32
    return %c0_i32, %c0_i32_0 : i32, i32
  }
  func.func @transform_6(%arg0: i32) -> (i32, i32) {
    %c0_i32 = arith.constant 0 : i32
    %c0_i32_0 = arith.constant 0 : i32
    %c0_i32_1 = arith.constant 0 : i32
    return %c0_i32, %c0_i32_0 : i32, i32
  }
  func.func @transform_7(%arg0: i32) -> (i32, i32) {
    %c0_i32 = arith.constant 0 : i32
    %c0_i32_0 = arith.constant 0 : i32
    %c0_i32_1 = arith.constant 0 : i32
    return %c0_i32, %c0_i32_0 : i32, i32
  }
  func.func @transform_8(%arg0: i32) -> (i32, i32) {
    %c0_i32 = arith.constant 0 : i32
    %c0_i32_0 = arith.constant 0 : i32
    %c0_i32_1 = arith.constant 0 : i32
    return %c0_i32, %c0_i32_0 : i32, i32
  }
  func.func @transform_9(%arg0: i32) -> (i32, i32) {
    %c0_i32 = arith.constant 0 : i32
    %c0_i32_0 = arith.constant 0 : i32
    return %arg0, %c0_i32 : i32, i32
  }
}

</mosaic_0001>

<bundles_post_ra>
// kernel: mlp_forward.1
= control target key start
LH: loop header
LB: loop body
LE: loop exit
PB: predicated region body
PF: predicated region fallthrough
CT: control target
= control target key end

     0   :  { %14 = vsyncpa [#allocation3], 0  ;;  %s841_s0 = inlined_call_operand.hbm [shape: f32[8,32], index: 0, kind: input, shape index: {}]   ;;  %s842_s1 = inlined_call_operand.vmem [shape: f32[1,32], index: 1, kind: input, shape index: {}]   ;;  %s843_s2 = inlined_call_operand.vmem [shape: f32[1,32], index: 2, kind: input, shape index: {}]   ;;  %s844_s3 = inlined_call_operand.hbm [shape: bf16[32,128], index: 3, kind: input, shape index: {}]   ;;  %s845_s4 = inlined_call_operand.vmem [shape: f32[1,128], index: 4, kind: input, shape index: {}]   ;;  %s846_s5 = inlined_call_operand.hbm [shape: bf16[128,128], index: 5, kind: input, shape index: {}]   ;;  %s847_s6 = inlined_call_operand.vmem [shape: f32[1,128], index: 6, kind: input, shape index: {}]   ;;  %s848_s7 = inlined_call_operand.hbm [shape: bf16[128,128], index: 7, kind: input, shape index: {}]   ;;  %s849_s8 = inlined_call_operand.vmem [shape: f32[1,128], index: 8, kind: input, shape index: {}]   ;;  %s850_s9 = inlined_call_operand.hbm [shape: f32[8,128], index: 9, kind: output, shape index: {}]  }
   0x1   :  { %15 = vsyncpa [#allocation6], 0 }
   0x2   :  { %16 = vsyncpa [#allocation9], 0 }
   0x3   :  { %17 = vsyncpa [#allocation4], 0  ;;  %s671_s30 = smov [#allocation5]   ;;  %s553_s13 = scalar_lea.hbm %s844_s3, 256 }
   0x4   :  { %s37_s10 = sshll.u32 %s671_s30, 4  ;;  %p554_p0 = scmp.ne.s32.totalorder %s844_s3, %s553_s13  ;;  %s38_s10 = int_to_ptr.vmem [resolvable:$true] %s37_s10 }
   0x5   :  { %p557_p1 = scmp.lt.u32.totalorder %s553_s13, %s844_s3 }
   0x7   :  { %p559_p2 = pnand %p557_p1, %p554_p0 }
   0x9   :  { %562 = shalt.err (!%p559_p2)
}
   0xa   :  { %s563_s18 = scalar_lea.vmem %s38_s10, 256  ;;  %p568_p4 = scmp.lt.s32.totalorder %s38_s10, %s38_s10 }
   0xb   :  { %p564_p3 = scmp.ne.s32.totalorder %s38_s10, %s563_s18  ;;  %p569_p5 = scmp.lt.s32.totalorder %s563_s18, %s563_s18 }
   0xd   :  { %p570_p6 = por %p569_p5, %p568_p4 }
   0xf   :  { %p571_p7 = pnand %p570_p6, %p564_p3 }
  0x11   :  { %574 = shalt.err (!%p571_p7)
}
  0x12   :  { %s672_s19 = smov 64   ;;  %s673_s20 = smov 4  }
  0x13   :  { %43 = dma.hbm_to_vmem [thread:$0]  %s844_s3, 256, %s38_s10, [#allocation6], %s672_s19, %s672_s19, %s673_s20  }
  0x14   :  { %s674_s23 = smov [#allocation2]   ;;  %s675_s25 = smov [#allocation7]  }
  0x15   :  { %s24_s24 = sshll.u32 %s674_s23, 4  ;;  %s51_s26 = sshll.u32 %s675_s25, 4  ;;  %s25_s24 = int_to_ptr.vmem [resolvable:$true] %s24_s24  ;;  %s52_s26 = int_to_ptr.vmem [resolvable:$true] %s51_s26 }
  0x16   :  { %s575_s29 = scalar_lea.hbm %s841_s0, 128 }
  0x17   :  { %p576_p8 = scmp.ne.s32.totalorder %s841_s0, %s575_s29  ;;  %p579_p9 = scmp.lt.u32.totalorder %s575_s29, %s841_s0 }
  0x19   :  { %p581_p10 = pnand %p579_p9, %p576_p8 }
  0x1b   :  { %584 = shalt.err (!%p581_p10)
}
  0x1c   :  { %s585_s3 = scalar_lea.vmem %s25_s24, 128  ;;  %p590_p12 = scmp.lt.s32.totalorder %s25_s24, %s25_s24 }
  0x1d   :  { %p586_p11 = scmp.ne.s32.totalorder %s25_s24, %s585_s3  ;;  %p591_p13 = scmp.lt.s32.totalorder %s585_s3, %s585_s3 }
  0x1f   :  { %p592_p0 = por %p591_p13, %p590_p12 }
  0x21   :  { %p593_p1 = pnand %p592_p0, %p586_p11 }
  0x23   :  { %596 = shalt.err (!%p593_p1)
}
  0x24   :  { %27 = dma.hbm_to_vmem [thread:$0]  %s841_s0, 128, %s25_s24, [#allocation3]  }
  0x25   :  { %s597_s17 = scalar_lea.hbm %s846_s5, 1024 }
  0x26   :  { %p598_p2 = scmp.ne.s32.totalorder %s846_s5, %s597_s17  ;;  %p601_p3 = scmp.lt.u32.totalorder %s597_s17, %s846_s5 }
  0x28   :  { %p603_p4 = pnand %p601_p3, %p598_p2 }
  0x2a   :  { %606 = shalt.err (!%p603_p4)
}
  0x2b   :  { %s607_s25 = scalar_lea.vmem %s52_s26, 1024  ;;  %p612_p6 = scmp.lt.s32.totalorder %s52_s26, %s52_s26 }
  0x2c   :  { %p608_p5 = scmp.ne.s32.totalorder %s52_s26, %s607_s25  ;;  %p613_p7 = scmp.lt.s32.totalorder %s607_s25, %s607_s25 }
  0x2e   :  { %p614_p8 = por %p613_p7, %p612_p6 }
  0x30   :  { %p615_p9 = pnand %p614_p8, %p608_p5 }
  0x32   :  { %618 = shalt.err (!%p615_p9)
}
  0x33   :  { %57 = dma.hbm_to_vmem [thread:$0]  %s846_s5, 1024, %s52_s26, [#allocation6], %s672_s19, %s672_s19, %s673_s20  }
  0x34   :  { %s676_s27 = smov [#allocation8]   ;;  %s619_s11 = scalar_lea.hbm %s848_s7, 1024 }
  0x35   :  { %s65_s28 = sshll.u32 %s676_s27, 4  ;;  %p620_p10 = scmp.ne.s32.totalorder %s848_s7, %s619_s11  ;;  %s66_s28 = int_to_ptr.vmem [resolvable:$true] %s65_s28 }
  0x36   :  { %p623_p11 = scmp.lt.u32.totalorder %s619_s11, %s848_s7 }
  0x38   :  { %p625_p12 = pnand %p623_p11, %p620_p10 }
  0x3a   :  { %628 = shalt.err (!%p625_p12)
}
  0x3b   :  { %s629_s14 = scalar_lea.vmem %s66_s28, 1024  ;;  %p634_p0 = scmp.lt.s32.totalorder %s66_s28, %s66_s28 }
  0x3c   :  { %p630_p13 = scmp.ne.s32.totalorder %s66_s28, %s629_s14  ;;  %p635_p1 = scmp.lt.s32.totalorder %s629_s14, %s629_s14 }
  0x3e   :  { %p636_p2 = por %p635_p1, %p634_p0 }
  0x40   :  { %p637_p3 = pnand %p636_p2, %p630_p13 }
  0x42   :  { %640 = shalt.err (!%p637_p3)
}
  0x43   :  { %71 = dma.hbm_to_vmem [thread:$0]  %s848_s7, 1024, %s66_s28, [#allocation9], %s672_s19, %s672_s19, %s673_s20  }
  0x44   :  { %663 = dma.done.wait [#allocation3], 128  }
  0x45   :  { %664 = vsyncadd [#allocation3], 4294967168 }
  0x46   :  { %665 = dma.done.wait [#allocation6], 1280  }
  0x47   :  { %666 = vsyncadd [#allocation6], 4294966016 }
  0x48   :  { %667 = dma.done.wait [#allocation9], 1024  }
  0x49   :  { %668 = vsyncadd [#allocation9], 4294966272  ;;  %vm88_vm0 = vcmask 261120   ;;  %v87_v0 = vld [vmem:[#allocation2] sm:$0xff]  ;;  %v533_v4 = vld [vmem:[#allocation5] sm:$0xff]   ;;  %v677_v5 = vmov 0.0  }
  0x4a   :  { %v89_v1 = vsel %vm88_vm0, %v87_v0, 0.0  ;;  %v93_v2 = vmul.f32 %v87_v0, %v87_v0  ;;  %476 = vmatprep.subr.bf16.mxu0 %v677_v5  ;;  %vm678_vm1 = vmmov 0   ;;  %v534_v6 = vld [vmem:[#allocation5 + $0x8] sm:$0xff]   ;;  %484 = vmatprep.subr.bf16.mxu1 %v677_v5  ;;  %v535_v7 = vld [vmem:[#allocation7] sm:$0xff]   ;;  %v536_v8 = vld [vmem:[#allocation7 + $0x8] sm:$0xff]   ;;  %s679_s21 = smov [#allocation10]  }
  0x4b   :  { %90 = vadd.xlane.f32.xlu0 %v89_v1  ;;  %480 = vmatprep.mubr.msk.bf16.mxu0 %vm678_vm1, %v677_v5  ;;  %v537_v9 = vld [vmem:[#allocation7 + $0x10] sm:$0xff]   ;;  %v538_v10 = vld [vmem:[#allocation7 + $0x18] sm:$0xff]   ;;  %v539_v11 = vld [vmem:[#allocation7 + $0x20] sm:$0xff]   ;;  %s420_s22 = sshll.u32 %s679_s21, 4  ;;  %s421_s22 = int_to_ptr.vmem [resolvable:$true] %s420_s22 }
  0x4c   :  { %v94_v3 = vsel %vm88_vm0, %v93_v2, 0.0  ;;  %477 = vmatpush3.bf16.msra.mxu0 %v533_v4  ;;  %500 = vmatprep.mubr.msk.bf16.mxu1 %vm678_vm1, %v677_v5  ;;  %v540_v12 = vld [vmem:[#allocation7 + $0x28] sm:$0xff]   ;;  %v541_v28 = vld [vmem:[#allocation7 + $0x30] sm:$0xff]   ;;  %v542_v29 = vld [vmem:[#allocation7 + $0x38] sm:$0xff]   ;;  %p646_p5 = scmp.lt.s32.totalorder %s421_s22, %s421_s22 }
  0x4d   :  { %478 = vmatprep.subr.bf16.mxu0 %v677_v5  ;;  %485 = vmatpush3.bf16.msra.mxu1 %v535_v7  ;;  %v431_v22 = vld [vmem:[%s842_s1] ss:$0 sm:$0xff]  ;;  %v543_v30 = vld [vmem:[#allocation8] sm:$0xff]   ;;  %v545_v32 = vld [vmem:[#allocation8 + $0x10] sm:$0xff]  }
  0x4e   :  { %486 = vmatprep.subr.bf16.mxu1 %v677_v5  ;;  %v432_v24 = vld [vmem:[%s843_s2] ss:$0 sm:$0xff]  ;;  %v546_v33 = vld [vmem:[#allocation8 + $0x18] sm:$0xff]   ;;  %v547_v34 = vld [vmem:[#allocation8 + $0x20] sm:$0xff]  }
  0x4f   :  { %95 = vadd.xlane.f32.xlu0 %v94_v3  ;;  %v544_v31 = vld [vmem:[#allocation8 + $0x8] sm:$0xff]   ;;  %v549_v44 = vld [vmem:[#allocation8 + $0x30] sm:$0xff]   ;;  %v550_v45 = vld [vmem:[#allocation8 + $0x38] sm:$0xff]  }
  0x50   :  { %479 = vmatpush3.bf16.msra.mxu0 %v534_v6  ;;  %v548_v35 = vld [vmem:[#allocation8 + $0x28] sm:$0xff]  }
  0x51   :  { %504 = vmatprep.subr.bf16.mxu0 %v677_v5  ;;  %487 = vmatpush3.bf16.msra.mxu1 %v536_v8  ;;  %v433_v36 = vld [vmem:[%s845_s4] ss:$0 sm:$0xff] }
  0x52   :  { %488 = vmatprep.subr.bf16.mxu1 %v677_v5  ;;  %v437_v46 = vld [vmem:[%s847_s6] ss:$0 sm:$0xff]  ;;  %s641_s6 = scalar_lea.vmem %s421_s22, 128 }
  0x53   :  { %v446_v54 = vld [vmem:[%s849_s8] ss:$0 sm:$0xff]  ;;  %p642_p4 = scmp.ne.s32.totalorder %s421_s22, %s641_s6  ;;  %p647_p6 = scmp.lt.s32.totalorder %s641_s6, %s641_s6 }
  0x55   :  { %489 = vmatpush3.bf16.msra.mxu1 %v537_v9  ;;  %p648_p7 = por %p647_p6, %p646_p5 }
  0x56   :  { %490 = vmatprep.subr.bf16.mxu1 %v677_v5 }
  0x57   :  { %p649_p8 = pnand %p648_p7, %p642_p4 }
  0x59   :  { %491 = vmatpush3.bf16.msra.mxu1 %v538_v10 }
  0x5a   :  { %492 = vmatprep.subr.bf16.mxu1 %v677_v5 }
  0x5d   :  { %493 = vmatpush3.bf16.msra.mxu1 %v539_v11 }
  0x5e   :  { %494 = vmatprep.subr.bf16.mxu1 %v677_v5 }
  0x61   :  { %495 = vmatpush3.bf16.msra.mxu1 %v540_v12 }
  0x62   :  { %496 = vmatprep.subr.bf16.mxu1 %v677_v5 }
  0x65   :  { %497 = vmatpush3.bf16.msra.mxu1 %v541_v28 }
  0x66   :  { %498 = vmatprep.subr.bf16.mxu1 %v677_v5 }
  0x69   :  { %499 = vmatpush3.bf16.msra.mxu1 %v542_v29 }
  0xd8   :  { %v91_v13 = vpop.xlane.xlu0 %90 }
  0xd9   :  { %v92_v14 = vmul.f32 0.03125, %v91_v13 }
  0xdb   :  { %v98_v16 = vmul.f32 %v92_v14, %v92_v14  ;;  %v100_v20 = vsub.f32 %v87_v0, %v92_v14 }
  0xdc   :  { %v96_v15 = vpop.xlane.xlu0 %95 }
  0xdd   :  { %v97_v17 = vmul.f32 0.03125, %v96_v15 }
  0xdf   :  { %v99_v18 = vsub.f32 %v97_v17, %v98_v16 }
  0xe1   :  { %v101_v19 = vadd.f32 1e-05, %v99_v18 }
  0xe3   :  { %551 = vrsqrt.f32 %v101_v19 }
  0xed   :  { %v552_v21 = vpop.eup %551 }
  0xee   :  { %v103_v23 = vmul.f32 %v552_v21, %v100_v20 }
  0xf0   :  { %v111_v25 = vmul.f32 %v431_v22, %v103_v23 }
  0xf2   :  { %v119_v26 = vadd.f32 %v432_v24, %v111_v25 }
  0xf4   :  { %v120_v27 = vpack.c.bf16 %v119_v26, %v119_v26 }
  0xf6   :  { %481 = vmatmul.mubr.msk.bf16.vlgmr.msra.gmra.mrb[0].mxu0 %vm88_vm0, %v120_v27 }
  0xf7   :  { %520 = vmatprep.mubr.msk.bf16.mxu0 %vm678_vm1, %v677_v5  ;;  %505 = vmatpush3.bf16.msra.mxu0 %v543_v30 }
  0xf8   :  { %506 = vmatprep.subr.bf16.mxu0 %v677_v5 }
  0xfb   :  { %507 = vmatpush3.bf16.msra.mxu0 %v544_v31 }
  0xfc   :  { %508 = vmatprep.subr.bf16.mxu0 %v677_v5 }
  0xff   :  { %509 = vmatpush3.bf16.msra.mxu0 %v545_v32 }
 0x100   :  { %510 = vmatprep.subr.bf16.mxu0 %v677_v5 }
 0x103   :  { %511 = vmatpush3.bf16.msra.mxu0 %v546_v33 }
 0x104   :  { %512 = vmatprep.subr.bf16.mxu0 %v677_v5 }
 0x107   :  { %513 = vmatpush3.bf16.msra.mxu0 %v547_v34 }
 0x108   :  { %514 = vmatprep.subr.bf16.mxu0 %v677_v5 }
 0x10b   :  { %515 = vmatpush3.bf16.msra.mxu0 %v548_v35 }
 0x10c   :  { %516 = vmatprep.subr.bf16.mxu0 %v677_v5 }
 0x10f   :  { %517 = vmatpush3.bf16.msra.mxu0 %v549_v44 }
 0x110   :  { %518 = vmatprep.subr.bf16.mxu0 %v677_v5 }
 0x113   :  { %519 = vmatpush3.bf16.msra.mxu0 %v550_v45 }
 0x1c9   :  { %v181_v37 = vpop.f32.mrb[0].mxu0 }
 0x1ca   :  { %v182_v38 = vadd.f32 %v433_v36, %v181_v37  ;;  %v482_v39 = vpop.f32.mrb[1].mxu0 }
 0x1cb   :  { %v184_v40 = vpop.f32.mrb[2].mxu0 }
 0x1cc   :  { %v187_v41 = vmax.f32 %v182_v38, 0.0  ;;  %v483_v42 = vpop.f32.mrb[3].mxu0 }
 0x1ce   :  { %v188_v43 = vpack.c.bf16 %v187_v41, %v187_v41 }
 0x1d0   :  { %501 = vmatmul.mubr.bf16.vlgmr.msra.gmra.mrb[0].mxu1 %v188_v43 }
 0x2a3   :  { %v294_v47 = vpop.f32.mrb[0].mxu1 }
 0x2a4   :  { %v295_v48 = vadd.f32 %v437_v46, %v294_v47  ;;  %v502_v49 = vpop.f32.mrb[1].mxu1 }
 0x2a5   :  { %v297_v50 = vpop.f32.mrb[2].mxu1 }
 0x2a6   :  { %v300_v51 = vmax.f32 %v295_v48, 0.0  ;;  %v503_v52 = vpop.f32.mrb[3].mxu1 }
 0x2a8   :  { %v301_v53 = vpack.c.bf16 %v300_v51, %v300_v51 }
 0x2aa   :  { %521 = vmatmul.mubr.bf16.vlgmr.msra.gmra.mrb[4].mxu0 %v301_v53 }
 0x37d   :  { %v407_v55 = vpop.f32.mrb[4].mxu0 }
 0x37e   :  { %v408_v56 = vadd.f32 %v446_v54, %v407_v55  ;;  %v522_v57 = vpop.f32.mrb[5].mxu0 }
 0x37f   :  { %v410_v58 = vpop.f32.mrb[6].mxu0 }
 0x380   :  { %413 = vst [vmem:[#allocation10] sm:$0xff] %v408_v56  ;;  %v523_v59 = vpop.f32.mrb[7].mxu0 }
 0x381   :  { %652 = shalt.err (!%p649_p8)
}
 0x382   :  { %s653_s8 = scalar_lea.hbm %s850_s9, 128 }
 0x383   :  { %p654_p9 = scmp.ne.s32.totalorder %s850_s9, %s653_s8  ;;  %p657_p10 = scmp.lt.u32.totalorder %s653_s8, %s850_s9 }
 0x385   :  { %p659_p11 = pnand %p657_p10, %p654_p9 }
 0x387   :  { %662 = shalt.err (!%p659_p11)
}
 0x388   :  { %423 = dma.vmem_to_hbm [thread:$0]  %s421_s22, 128, %s850_s9, [#allocation4]  }
 0x389   :  { %669 = dma.done.wait [#allocation4], 128  }
 0x38a   :  { %670 = vsyncadd [#allocation4], 4294967168 }
 0x38b   :  { %427 = vsyncpa [#allocation3], 1 }
 0x38c   :  { %428 = vsyncpa [#allocation6], 1 }
 0x38d   :  { %429 = vsyncpa [#allocation9], 1 }
 0x38e   :  { %430 = vsyncpa [#allocation4], 1 }

</bundles_post_ra>
